<compile_context>
chip_gen: v7x
topology: tpu7x:2x2x1
jax: 0.10.0
libtpu: 0.0.40
codegen_flags: <defaults>
</compile_context>

<pallas_src>
import jax
import jax.numpy as jnp
from jax import lax
from jax.experimental import pallas as pl
from jax.experimental.pallas import tpu as pltpu


_MASK_VALUE = -1e30                      # large finite negative (bf16-safe masking)
_VMEM_LIMIT_BYTES = 48 * 1024 * 1024     # headroom below v7x's 64 MiB per-TC VMEM


# --------------------------------------------------------------------------- #
# Kernel 1: fused QKV projection over a flattened M = B*T axis.
# --------------------------------------------------------------------------- #
def _qkv_proj_kernel(x_ref, w_ref, qkv_ref):
    """One MXU matmul per M tile: x @ [Wq*scale | Wk | Wv] -> fused qkv tile."""
    qkv_ref[...] = jnp.dot(
        x_ref[...], w_ref[...], preferred_element_type=jnp.float32
    ).astype(qkv_ref.dtype)


# --------------------------------------------------------------------------- #
# Kernel 2: causal flash attention with online softmax.
# grid = (B, T//tq, T//tk); kv axis is the reduction ("arbitrary") axis and
# carries f32 m/l/acc VMEM scratch.
# --------------------------------------------------------------------------- #
def _flash_attn_kernel(q_ref, k_ref, v_ref, o_ref, m_sc, l_sc, acc_sc):
    qi = pl.program_id(1)
    ki = pl.program_id(2)
    tq = q_ref.shape[1]
    tk = k_ref.shape[1]
    q_start = qi * tq
    kv_start = ki * tk

    @pl.when(ki == 0)
    def _init():
        m_sc[...] = jnp.full_like(m_sc, -jnp.inf)
        l_sc[...] = jnp.zeros_like(l_sc)
        acc_sc[...] = jnp.zeros_like(acc_sc)

    # Block has at least one unmasked (col <= row) entry.
    valid = kv_start < q_start + tq
    # Block touches the masked upper triangle (needs the iota mask).
    straddles = kv_start + tk > q_start + 1

    def _update(apply_mask):
        q = q_ref[0]                     # (tq, D) — already scaled by 1/sqrt(D)
        k = k_ref[0]                     # (tk, D)
        v = v_ref[0]                     # (tk, D)
        # q @ k^T via dot_general contracting the last dims (no explicit k.T).
        s = lax.dot_general(q, k, (((1,), (1,)), ((), ())),
                            preferred_element_type=jnp.float32)   # (tq, tk) f32
        if apply_mask:
            row = q_start + lax.broadcasted_iota(jnp.int32, (tq, tk), 0)
            col = kv_start + lax.broadcasted_iota(jnp.int32, (tq, tk), 1)
            s = jnp.where(col > row, _MASK_VALUE, s)

        m_prev = m_sc[...]
        m_new = jnp.maximum(m_prev, jnp.max(s, axis=-1, keepdims=True))
        alpha = jnp.exp(m_prev - m_new)
        p = jnp.exp(s - m_new)
        l_sc[...] = alpha * l_sc[...] + jnp.sum(p, axis=-1, keepdims=True)
        acc_sc[...] = alpha * acc_sc[...] + jnp.dot(
            p.astype(v.dtype), v, preferred_element_type=jnp.float32)
        m_sc[...] = m_new

    # Fully-past blocks: no mask work (saves two (tq,tk) iotas + cmp + select).
    @pl.when(valid & jnp.logical_not(straddles))
    def _no_mask():
        _update(apply_mask=False)

    # Diagonal-straddling blocks: apply the causal mask.
    @pl.when(valid & straddles)
    def _with_mask():
        _update(apply_mask=True)

    @pl.when(ki == pl.num_programs(2) - 1)
    def _finalize():
        # Exact reciprocal: (tq, 1) once per output block — cost is negligible,
        # keeps parity with the f32 PyTorch module.
        inv_l = pl.reciprocal(l_sc[...], approx=False)
        o_ref[0] = (acc_sc[...] * inv_l).astype(o_ref.dtype)


# --------------------------------------------------------------------------- #
# Tiling heuristics.
# --------------------------------------------------------------------------- #
def _preferred_seq_tiles():
    """(q_tile, kv_tile) preferences. MXU-fill driven, not VMEM driven."""
    try:
        vmem_bytes = pltpu.get_tpu_info().vmem_capacity_bytes
    except Exception:
        vmem_bytes = 64 * 1024 * 1024
    if vmem_bytes > 64 * 1024 * 1024:    # v5e / v6e (128 MiB per core)
        return 256, 512                  # deeper kv tiles: fewer steps, hide DMA
    return 256, 256                      # v7x (64 MiB per TC): 256 fills the MXU


def _pick_tile(extent, preferred, min_multiple):
    """Largest divisor of `extent` that is <= preferred and a multiple of
    min_multiple; falls back to the full extent (always layout-legal)."""
    for cand in range(min(preferred, extent), min_multiple - 1, -1):
        if extent % cand == 0 and cand % min_multiple == 0:
            return cand
    return extent


# --------------------------------------------------------------------------- #
# Wrapper.
# --------------------------------------------------------------------------- #
def causal_attention(x, w_query, w_key, w_value, *, compute_dtype=jnp.bfloat16,
                     q_tile=None, kv_tile=None):
    """x: (B, T, D_in); w_*: (D_in, D_out). Returns (B, T, D_out) in x.dtype.

    compute_dtype: dtype fed to the MXU. Defaults to bfloat16 (2-4x matmul
    throughput, halved intermediate HBM traffic); accumulation and softmax stay
    f32 regardless. Pass jnp.float32 for exact parity with the f32 PyTorch
    module (bf16 deviates slightly from torch numerics, as expected).
    """
    B, T, D_in = x.shape
    D_out = w_query.shape[1]
    scale = 1.0 / (D_out ** 0.5)

    # Fused QKV weight with the softmax scale folded into the Q columns
    # (one-time O(D_in*D_out) prep — no (T, T) scale multiply in the kernels).
    w_qkv = jnp.concatenate(
        [w_query.astype(jnp.float32) * scale,
         w_key.astype(jnp.float32),
         w_value.astype(jnp.float32)], axis=1).astype(compute_dtype)
    x2d = x.reshape(B * T, D_in).astype(compute_dtype)   # collapse (B,T) -> M

    # Sub-32-bit dtypes pack rows along sublanes: force tile multiples of 16
    # (bf16) / 32 (int8/fp8) so loads/stores stay relayout-free.
    itemsize = jnp.dtype(compute_dtype).itemsize
    min_mult = {4: 8, 2: 16, 1: 32}.get(itemsize, 8)
    pref_q, pref_kv = _preferred_seq_tiles()
    tq = q_tile if q_tile is not None else _pick_tile(T, pref_q, min_mult)
    tk = kv_tile if kv_tile is not None else _pick_tile(T, pref_kv, min_mult)
    if T % tq != 0 or T % tk != 0:
        raise ValueError(
            f"q_tile/kv_tile must divide the sequence length: T={T}, "
            f"q_tile={tq}, kv_tile={tk}")
    tm = _pick_tile(B * T, max(pref_q, pref_kv), min_mult)

    # --- Kernel 1: fused QKV projection over M = B*T ------------------------
    qkv2d = pl.pallas_call(
        _qkv_proj_kernel,
        out_shape=jax.ShapeDtypeStruct((B * T, 3 * D_out), compute_dtype),
        grid_spec=pltpu.PrefetchScalarGridSpec(
            num_scalar_prefetch=0,
            grid=(B * T // tm,),
            in_specs=[
                pl.BlockSpec((tm, D_in), lambda m: (m, 0)),
                # Invariant weight block (constant index_map -> fetched once).
                pl.BlockSpec((D_in, 3 * D_out), lambda m: (0, 0)),
            ],
            # One fused lane-dense output (3*D_out wide) instead of 3 narrow ones.
            out_specs=pl.BlockSpec((tm, 3 * D_out), lambda m: (m, 0)),
        ),
        compiler_params=pltpu.CompilerParams(
            dimension_semantics=("parallel",),
            vmem_limit_bytes=_VMEM_LIMIT_BYTES),
    )(x2d, w_qkv)
    qkv = qkv2d.reshape(B, T, 3 * D_out)   # free view of a contiguous array

    # --- Kernel 2: causal flash attention with online softmax ---------------
    def q_map(b, qi, ki):
        return (b, qi, 0)

    def make_kv_map(col_block):
        # Clamp the kv block index to the last block that contains any
        # unmasked entry for this q tile. Skipped (future) blocks re-request
        # the same block index, so Pallas elides their HBM DMA entirely.
        def kv_map(b, qi, ki):
            last_valid = (qi * tq + tq - 1) // tk
            return (b, jnp.minimum(ki, last_valid), col_block)
        return kv_map

    if D_out % 128 == 0:
        # Fully lane-dense: read Q/K/V straight out of the fused qkv array via
        # column block offsets — no split copy at all.
        q_in, k_in, v_in = qkv, qkv, qkv
        q_spec = pl.BlockSpec((1, tq, D_out), q_map)
        k_spec = pl.BlockSpec((1, tk, D_out), make_kv_map(1))
        v_spec = pl.BlockSpec((1, tk, D_out), make_kv_map(2))
    else:
        # Sub-128 D_out: split with cheap wrapper views instead of in-kernel
        # slices (which would cross (8,128) lane tiles).
        q_in = qkv[..., :D_out]
        k_in = qkv[..., D_out:2 * D_out]
        v_in = qkv[..., 2 * D_out:]
        q_spec = pl.BlockSpec((1, tq, D_out), q_map)
        k_spec = pl.BlockSpec((1, tk, D_out), make_kv_map(0))
        v_spec = pl.BlockSpec((1, tk, D_out), make_kv_map(0))

    return pl.pallas_call(
        _flash_attn_kernel,
        out_shape=jax.ShapeDtypeStruct((B, T, D_out), x.dtype),
        grid_spec=pltpu.PrefetchScalarGridSpec(
            num_scalar_prefetch=0,
            grid=(B, T // tq, T // tk),
            in_specs=[q_spec, k_spec, v_spec],
            out_specs=pl.BlockSpec((1, tq, D_out), q_map),
            scratch_shapes=[
                pltpu.VMEM((tq, 1), jnp.float32),       # running max  m
                pltpu.VMEM((tq, 1), jnp.float32),       # running sum  l
                pltpu.VMEM((tq, D_out), jnp.float32),   # running acc  (numerator)
            ],
        ),
        compiler_params=pltpu.CompilerParams(
            dimension_semantics=("parallel", "parallel", "arbitrary"),
            vmem_limit_bytes=_VMEM_LIMIT_BYTES),
    )(q_in, k_in, v_in)


def causal_attention_ref(x, w_query, w_key, w_value):
    """Pure-JAX reference matching the PyTorch forward."""
    q = x @ w_query
    k = x @ w_key
    v = x @ w_value
    scores = jnp.einsum("btd,bsd->bts", q, k)
    T = x.shape[1]
    mask = jnp.triu(jnp.ones((T, T), dtype=bool), k=1)
    scores = jnp.where(mask[None], -jnp.inf, scores)
    w = jax.nn.softmax(scores / (k.shape[-1] ** 0.5), axis=-1)
    return w @ v


if __name__ == "__main__":
    # Small shapes consistent with the module: batch=2, seq=16, d_in=32, d_out=16
    B, T, D_in, D_out = 2, 16, 32, 16

    key = jax.random.PRNGKey(0)
    kx, kq, kk, kv = jax.random.split(key, 4)
    x = jax.random.uniform(kx, (B, T, D_in), dtype=jnp.float32)
    # Deterministic nn.Linear-style weights (bias=False), stored transposed as
    # (D_in, D_out) so the projection is x @ W.
    w_query = jax.random.uniform(kq, (D_in, D_out), dtype=jnp.float32) * 0.1
    w_key = jax.random.uniform(kk, (D_in, D_out), dtype=jnp.float32) * 0.1
    w_value = jax.random.uniform(kv, (D_in, D_out), dtype=jnp.float32) * 0.1

    ref = causal_attention_ref(x, w_query, w_key, w_value)

    # f32 MXU path: parity with the float32 PyTorch module.
    out_f32 = jax.block_until_ready(
        causal_attention(x, w_query, w_key, w_value, compute_dtype=jnp.float32))
    assert out_f32.shape == (B, T, D_out)
    assert jnp.allclose(out_f32, ref, atol=5e-3, rtol=5e-3), "f32 path mismatch"

    # Default (bf16 MXU) fast path: same semantics, reduced-precision matmuls.
    out_bf16 = jax.block_until_ready(
        causal_attention(x, w_query, w_key, w_value))
    assert out_bf16.shape == (B, T, D_out)
    assert jnp.allclose(out_bf16, ref, atol=5e-2, rtol=5e-2), "bf16 path mismatch"

    print("KERNEL_OK")
</pallas_src>

<mosaic_0001>
module attributes {stable_mosaic.version = 11 : i64} {
  func.func @_qkv_proj_kernel(%arg0: i32, %arg1: memref<32x32xf32, #tpu.memory_space<vmem>>, %arg2: memref<32x48xf32, #tpu.memory_space<vmem>>, %arg3: memref<32x48xf32, #tpu.memory_space<vmem>>) attributes {dimension_semantics = [#tpu.dimension_semantics<parallel>], iteration_bounds = array<i64: 1>, scalar_prefetch = 0 : i64, scratch_operands = 0 : i64, tpu.core_type = #tpu.core_type<tc>, window_params = [{transform_indices = @transform_0, window_bounds = array<i64: 32, 32>}, {pipeline_mode = #tpu.pipeline_mode<synchronous>, transform_indices = @transform_1, window_bounds = array<i64: 32, 48>}, {transform_indices = @transform_2, window_bounds = array<i64: 32, 48>}]} {
    %c0 = arith.constant 0 : index
    %c0_0 = arith.constant 0 : index
    %0 = vector.load %arg1[%c0, %c0_0] : memref<32x32xf32, #tpu.memory_space<vmem>>, vector<32x32xf32>
    %c0_1 = arith.constant 0 : index
    %c0_2 = arith.constant 0 : index
    %1 = vector.load %arg2[%c0_1, %c0_2] : memref<32x48xf32, #tpu.memory_space<vmem>>, vector<32x48xf32>
    %cst = arith.constant dense<0.000000e+00> : vector<32x48xf32>
    %2 = tpu.matmul %0, %1, %cst {dimension_numbers = #tpu.dot_dimension_numbers<[1], [0], [0], [1], [0, 0, 1, 1], [], []>} : vector<32x32xf32>, vector<32x48xf32>, vector<32x48xf32> -> vector<32x48xf32>
    %c0_3 = arith.constant 0 : index
    %c0_4 = arith.constant 0 : index
    %3 = vector.load %arg3[%c0_3, %c0_4] : memref<32x48xf32, #tpu.memory_space<vmem>>, vector<32x48xf32>
    tpu.vector_store %arg3[%c0_3, %c0_4], %2 {strides = array<i32>} : memref<32x48xf32, #tpu.memory_space<vmem>>, vector<32x48xf32>,
    return
  }
  func.func @transform_0(%arg0: i32) -> (i32, i32) {
    %c0_i32 = arith.constant 0 : i32
    %c0_i32_0 = arith.constant 0 : i32
    return %arg0, %c0_i32 : i32, i32
  }
  func.func @transform_1(%arg0: i32) -> (i32, i32) {
    %c0_i32 = arith.constant 0 : i32
    %c0_i32_0 = arith.constant 0 : i32
    %c0_i32_1 = arith.constant 0 : i32
    return %c0_i32, %c0_i32_0 : i32, i32
  }
  func.func @transform_2(%arg0: i32) -> (i32, i32) {
    %c0_i32 = arith.constant 0 : i32
    %c0_i32_0 = arith.constant 0 : i32
    return %arg0, %c0_i32 : i32, i32
  }
}

</mosaic_0001>

<bundles_post_ra>
// kernel: tpu_custom_call.1
= control target key start
LH: loop header
LB: loop body
LE: loop exit
PB: predicated region body
PF: predicated region fallthrough
CT: control target
= control target key end

     0   :  { %7 = vsyncpa [#allocation3], 0  ;;  %s353_s0 = inlined_call_operand.hbm [shape: f32[32,32], index: 0, kind: input, shape index: {}]   ;;  %s354_s1 = inlined_call_operand.hbm [shape: f32[32,48], index: 1, kind: input, shape index: {}]   ;;  %s355_s2 = inlined_call_operand.hbm [shape: f32[32,48], index: 2, kind: output, shape index: {}]  }
   0x1   :  { %8 = vsyncpa [#allocation6], 0 }
   0x2   :  { %9 = vsyncpa [#allocation4], 0  ;;  %s284_s9 = smov [#allocation2]   ;;  %s212_s13 = scalar_lea.hbm %s353_s0, 512 }
   0x3   :  { %s15_s10 = sshll.u32 %s284_s9, 4  ;;  %p213_p0 = scmp.ne.s32.totalorder %s353_s0, %s212_s13  ;;  %s16_s10 = int_to_ptr.vmem [resolvable:$true] %s15_s10 }
   0x4   :  { %p216_p1 = scmp.lt.u32.totalorder %s212_s13, %s353_s0 }
   0x6   :  { %p218_p2 = pnand %p216_p1, %p213_p0 }
   0x8   :  { %221 = shalt.err (!%p218_p2)
}
   0x9   :  { %s222_s18 = scalar_lea.vmem %s16_s10, 512  ;;  %p227_p4 = scmp.lt.s32.totalorder %s16_s10, %s16_s10 }
   0xa   :  { %p223_p3 = scmp.ne.s32.totalorder %s16_s10, %s222_s18  ;;  %p228_p5 = scmp.lt.s32.totalorder %s222_s18, %s222_s18 }
   0xc   :  { %p229_p6 = por %p228_p5, %p227_p4 }
   0xe   :  { %p230_p7 = pnand %p229_p6, %p223_p3 }
  0x10   :  { %233 = shalt.err (!%p230_p7)
}
  0x11   :  { %s285_s19 = smov 128   ;;  %s286_s20 = smov 8  }
  0x12   :  { %21 = dma.hbm_to_vmem [thread:$0]  %s353_s0, 512, %s16_s10, [#allocation3], %s285_s19, %s285_s19, %s286_s20  }
  0x13   :  { %s287_s23 = smov [#allocation5]   ;;  %s234_s27 = scalar_lea.hbm %s354_s1, 512 }
  0x14   :  { %s27_s24 = sshll.u32 %s287_s23, 4  ;;  %p235_p8 = scmp.ne.s32.totalorder %s354_s1, %s234_s27  ;;  %s28_s24 = int_to_ptr.vmem [resolvable:$true] %s27_s24 }
  0x15   :  { %p238_p9 = scmp.lt.u32.totalorder %s234_s27, %s354_s1 }
  0x17   :  { %p240_p10 = pnand %p238_p9, %p235_p8 }
  0x19   :  { %243 = shalt.err (!%p240_p10)
}
  0x1a   :  { %s244_s4 = scalar_lea.vmem %s28_s24, 512  ;;  %p249_p12 = scmp.lt.s32.totalorder %s28_s24, %s28_s24 }
  0x1b   :  { %p245_p11 = scmp.ne.s32.totalorder %s28_s24, %s244_s4  ;;  %p250_p13 = scmp.lt.s32.totalorder %s244_s4, %s244_s4 }
  0x1d   :  { %p251_p0 = por %p250_p13, %p249_p12 }
  0x1f   :  { %p252_p1 = pnand %p251_p0, %p245_p11 }
  0x21   :  { %255 = shalt.err (!%p252_p1)
}
  0x22   :  { %33 = dma.hbm_to_vmem [thread:$0]  %s354_s1, 512, %s28_s24, [#allocation6], %s285_s19, %s285_s19, %s286_s20  }
  0x23   :  { %278 = dma.done.wait [#allocation3], 512  }
  0x24   :  { %279 = vsyncadd [#allocation3], 4294966784 }
  0x25   :  { %280 = dma.done.wait [#allocation6], 512  }
  0x26   :  { %281 = vsyncadd [#allocation6], 4294966784  ;;  %vm48_vm0 = vcmask 261120   ;;  %v44_v0 = vld [vmem:[#allocation5] sm:$0xff]  ;;  %v45_v1 = vld [vmem:[#allocation5 + $0x8] sm:$0xff]  ;;  %s288_s1 = smov [#allocation7]  }
  0x27   :  { %v46_v2 = vld [vmem:[#allocation5 + $0x10] sm:$0xff]  ;;  %v195_v3 = vpack.c.bf16 %v45_v1, %v44_v0  ;;  %v47_v4 = vld [vmem:[#allocation5 + $0x18] sm:$0xff]  ;;  %v40_v5 = vld [vmem:[#allocation2] sm:$0xff]  ;;  %s156_s6 = sshll.u32 %s288_s1, 4  ;;  %vm146_vm1 = vcmask 392192   ;;  %s157_s6 = int_to_ptr.vmem [resolvable:$true] %s156_s6 }
  0x28   :  { %v42_v6 = vld [vmem:[#allocation2 + $0x10] sm:$0xff]  ;;  %v199_v7 = vpack.c.bf16 %v47_v4, %v46_v2  ;;  %189 = vmatprep.mubr.msk.f32.mxu0 %vm48_vm0, %v40_v5  ;;  %v41_v8 = vld [vmem:[#allocation2 + $0x8] sm:$0xff]  ;;  %v43_v9 = vld [vmem:[#allocation2 + $0x18] sm:$0xff]  ;;  %s256_s7 = scalar_lea.vmem %s157_s6, 512  ;;  %p261_p3 = scmp.lt.s32.totalorder %s157_s6, %s157_s6 }
  0x29   :  { %192 = vmatprep.mubr.msk.f32.mxu1 %vm48_vm0, %v42_v6  ;;  %196 = vmatprep.subr.bf16.mxu0 %v195_v3  ;;  %p257_p2 = scmp.ne.s32.totalorder %s157_s6, %s256_s7  ;;  %p262_p4 = scmp.lt.s32.totalorder %s256_s7, %s256_s7 }
  0x2a   :  { %203 = vmatprep.subr.bf16.mxu1 %v195_v3  ;;  %198 = vmatpush3.bf16.msra.mxu0 %v195_v3 }
  0x2b   :  { %205 = vmatpush3.bf16.msra.mxu1 %v195_v3  ;;  %200 = vmatprep.subr.bf16.mxu0 %v199_v7  ;;  %p263_p5 = por %p262_p4, %p261_p3 }
  0x2c   :  { %204 = vmatprep.subr.bf16.mxu1 %v199_v7 }
  0x2d   :  { %p264_p6 = pnand %p263_p5, %p257_p2 }
  0x2e   :  { %202 = vmatpush3.bf16.msra.mxu0 %v199_v7 }
  0x2f   :  { %206 = vmatpush3.bf16.msra.mxu1 %v199_v7 }
  0x31   :  { %190 = vmatmul.mubr.msk.f32.vlgmr.msra.gmra.mrb[0].mxu0 %vm48_vm0, %v41_v8 }
  0x32   :  { %193 = vmatmul.mubr.msk.f32.vlgmr.msra.gmra.mrb[0].mxu1 %vm48_vm0, %v43_v9 }
 0x104   :  { %v191_v10 = vpop.f32.mrb[0].mxu0 }
 0x105   :  { %v194_v11 = vpop.f32.mrb[0].mxu1  ;;  %148 = vst.msk [vmem:[#allocation7 + $0x8] sm:$0xff] %vm146_vm1, %v191_v10  ;;  %v127_v12 = vpop.f32.mrb[1].mxu0 }
 0x106   :  { %150 = vst.msk [vmem:[#allocation7 + $0x18] sm:$0xff] %vm146_vm1, %v194_v11  ;;  %v137_v13 = vpop.f32.mrb[1].mxu1  ;;  %147 = vst.msk [vmem:[#allocation7] sm:$0xff] %vm146_vm1, %v127_v12 }
 0x107   :  { %149 = vst.msk [vmem:[#allocation7 + $0x10] sm:$0xff] %vm146_vm1, %v137_v13 }
 0x108   :  { %267 = shalt.err (!%p264_p6)
}
 0x109   :  { %s268_s10 = scalar_lea.hbm %s355_s2, 512 }
 0x10a   :  { %p269_p7 = scmp.ne.s32.totalorder %s355_s2, %s268_s10  ;;  %p272_p8 = scmp.lt.u32.totalorder %s268_s10, %s355_s2 }
 0x10c   :  { %p274_p9 = pnand %p272_p8, %p269_p7 }
 0x10e   :  { %277 = shalt.err (!%p274_p9)
}
 0x10f   :  { %162 = dma.vmem_to_hbm [thread:$0]  %s157_s6, 512, %s355_s2, [#allocation4], %s285_s19, %s285_s19, %s286_s20  }
 0x110   :  { %282 = dma.done.wait [#allocation4], 512  }
 0x111   :  { %283 = vsyncadd [#allocation4], 4294966784 }
 0x112   :  { %166 = vsyncpa [#allocation3], 1 }
 0x113   :  { %167 = vsyncpa [#allocation6], 1 }
 0x114   :  { %168 = vsyncpa [#allocation4], 1 }

</bundles_post_ra>
